<compile_context>
chip_gen: v5e
topology: v5e:2x2
jax: 0.10.0
libtpu: 0.0.40
codegen_flags: <defaults>
</compile_context>

<pallas_src>
import math

import jax
import jax.numpy as jnp
from jax import lax
from jax.experimental import pallas as pl
from jax.experimental.pallas import tpu as pltpu


# ----------------------------------------------------------------------------
# helpers
# ----------------------------------------------------------------------------
def _round_up(x, m):
    return ((x + m - 1) // m) * m


def _pick_tile(dim, preferred, granule):
    """Largest multiple of `granule` <= min(preferred, dim) that divides `dim`.

    Falls back to the full `dim` (a legal block shape by the "equal to the
    full array dim" rule) so the caller never has to pad the array.
    """
    t = (min(preferred, dim) // granule) * granule
    while t >= granule:
        if dim % t == 0:
            return t
        t -= granule
    return dim


def _vmem_footprint(tm, tn, k_resident, w_itemsize, n_scratch=0):
    """Double-buffered per-step VMEM estimate (bytes) for the chosen tiles."""
    x_b = 2 * tm * k_resident * 4                      # x tile (f32)
    w_b = 2 * 2 * tn * k_resident * w_itemsize         # W_mu + W_sigma tiles
    o_b = 2 * tm * tn * 4                              # output tile
    vec_b = 2 * (k_resident * 4 + 2 * tn * 4)          # eps_in + [eps_out;bias]
    scr_b = n_scratch * tm * tn * 4                    # f32 accumulators
    return x_b + w_b + o_b + vec_b + scr_b


def _vmem_limit(footprint_bytes):
    """Scoped-VMEM limit = footprint + compiler-scratch margin, clamped to a
    range safe on v5e/v6e (128 MiB phys) and v7x (64 MiB phys)."""
    return int(min(56 * 1024 * 1024,
                   max(footprint_bytes + 8 * 1024 * 1024, 16 * 1024 * 1024)))


# ----------------------------------------------------------------------------
# kernels
# ----------------------------------------------------------------------------
_NT_DIMS = (((1,), (1,)), ((), ()))   # contract on in_features of both operands


def _noisy_linear_fullk_kernel(x_ref, wmu_ref, wsig_ref, eps_in_ref, eo_b_ref,
                               o_ref):
    """One (tm, tn) step with the full K (in_features) resident.

    y = x @ Wmu^T + eps_out * ((x * eps_in) @ Wsig^T) + bias
    (algebraically identical to using the noisy weight, but never materializes
    an [out, in] temporary).
    """
    wdt = wmu_ref.dtype
    x = x_ref[...]                                        # [tm, K] f32
    mu = lax.dot_general(x.astype(wdt), wmu_ref[...], _NT_DIMS,
                         preferred_element_type=jnp.float32)          # [tm,tn]
    sig = lax.dot_general((x * eps_in_ref[...]).astype(wdt), wsig_ref[...],
                          _NT_DIMS, preferred_element_type=jnp.float32)
    eps_out = eo_b_ref[0:1, :]                            # [1, tn]
    bias = eo_b_ref[1:2, :]                               # [1, tn]
    o_ref[...] = (mu + eps_out * sig + bias).astype(o_ref.dtype)


def _noisy_linear_kgrid_kernel(x_ref, wmu_ref, wsig_ref, eps_in_ref, eo_b_ref,
                               o_ref, acc_mu_ref, acc_sig_ref):
    """Fallback: (M, N, K) grid with f32 accumulators; eps_out scaling and the
    bias add are deferred to the k == last finalize step."""
    k = pl.program_id(2)

    @pl.when(k == 0)
    def _():
        acc_mu_ref[...] = jnp.zeros_like(acc_mu_ref)
        acc_sig_ref[...] = jnp.zeros_like(acc_sig_ref)

    wdt = wmu_ref.dtype
    x = x_ref[...]                                        # [tm, tk] f32
    acc_mu_ref[...] += lax.dot_general(x.astype(wdt), wmu_ref[...], _NT_DIMS,
                                       preferred_element_type=jnp.float32)
    acc_sig_ref[...] += lax.dot_general((x * eps_in_ref[...]).astype(wdt),
                                        wsig_ref[...], _NT_DIMS,
                                        preferred_element_type=jnp.float32)

    @pl.when(k == pl.num_programs(2) - 1)
    def _():
        eps_out = eo_b_ref[0:1, :]
        bias = eo_b_ref[1:2, :]
        o_ref[...] = (acc_mu_ref[...] + eps_out * acc_sig_ref[...]
                      + bias).astype(o_ref.dtype)


# ----------------------------------------------------------------------------
# wrapper
# ----------------------------------------------------------------------------
def noisy_linear_forward(x, weight_mu, weight_sigma, eps_in, eps_out,
                         bias_mu, bias_sigma, bias_eps,
                         tm=None, tn=None, tk=None,
                         vmem_data_budget=28 * 1024 * 1024):
    """Training-mode factorized NoisyLinear forward.

    x: [B, in] (f32); weight_*: [out, in] (f32 or bf16); eps_in: [in];
    eps_out / bias_*: [out].  Returns [B, out] in x.dtype.
    """
    B, in_f = x.shape
    out_f = weight_mu.shape[0]
    wsz = jnp.dtype(weight_mu.dtype).itemsize

    # Tiny O(out)+O(in) host prep; NO [out, in] temporaries, NO weight padding.
    bias = (bias_mu.astype(jnp.float32)
            + bias_sigma.astype(jnp.float32) * bias_eps.astype(jnp.float32))
    eo_b = jnp.stack([eps_out.astype(jnp.float32), bias], axis=0)   # [2, out]
    eps_in2 = eps_in.astype(jnp.float32).reshape(1, in_f)           # [1, in]

    # ---- tile selection ----------------------------------------------------
    # tn: largest 128-multiple divisor of out_features up to 512 (else full
    #     out_features) -> lane-dense and never requires weight padding; for
    #     out_features >= 1024 this also yields >=2 N blocks so v7x's two
    #     TensorCores both get work on the "parallel" axis.
    if tn is None:
        tn = _pick_tile(out_f, 512, 128)
    elif out_f % tn != 0:
        tn = _pick_tile(out_f, tn, 128)
    # tm: sublane-aligned batch rows, up to 512 (fewer re-reads of the weights
    #     across the M grid for large batches).
    if tm is None:
        tm = min(_round_up(B, 8), 512)

    if tk is None:
        # Prefer a fully resident K (no K axis, no accumulator) if the
        # double-buffered footprint fits; shrink tm, then tn, before giving up.
        fits = _vmem_footprint(tm, tn, in_f, wsz) <= vmem_data_budget
        while not fits and tm > 8:
            tm = max(8, (tm // 2) // 8 * 8)
            fits = _vmem_footprint(tm, tn, in_f, wsz) <= vmem_data_budget
        while not fits and tn > 128:
            new_tn = _pick_tile(out_f, tn // 2, 128)
            if new_tn >= tn:
                break
            tn = new_tn
            fits = _vmem_footprint(tm, tn, in_f, wsz) <= vmem_data_budget
        tk = in_f if fits else _pick_tile(in_f, 512, 128)

    use_full_k = tk >= in_f
    if use_full_k:
        tk = in_f

    # Only x is padded (batch rows to a tile multiple) -- a few KB at most.
    Mp = _round_up(B, tm)
    x_p = x if Mp == B else jnp.pad(x, ((0, Mp - B), (0, 0)))

    wmu, wsig = weight_mu, weight_sigma
    if not use_full_k:
        Kp = _round_up(in_f, tk)
        if Kp != in_f:
            # TODO(synk): rare corner (huge in_features with no 128-multiple
            # divisor) -- pads the weights once per call; acceptable fallback.
            x_p = jnp.pad(x_p, ((0, 0), (0, Kp - in_f)))
            wmu = jnp.pad(wmu, ((0, 0), (0, Kp - in_f)))
            wsig = jnp.pad(wsig, ((0, 0), (0, Kp - in_f)))
            eps_in2 = jnp.pad(eps_in2, ((0, 0), (0, Kp - in_f)))
    else:
        Kp = in_f

    if use_full_k:
        grid = (Mp // tm, out_f // tn)
        footprint = _vmem_footprint(tm, tn, in_f, wsz)
        out = pl.pallas_call(
            _noisy_linear_fullk_kernel,
            out_shape=jax.ShapeDtypeStruct((Mp, out_f), x.dtype),
            grid_spec=pltpu.PrefetchScalarGridSpec(
                num_scalar_prefetch=0,
                grid=grid,
                in_specs=[
                    pl.BlockSpec((tm, in_f), lambda i, j: (i, 0)),   # x
                    pl.BlockSpec((tn, in_f), lambda i, j: (j, 0)),   # W_mu
                    pl.BlockSpec((tn, in_f), lambda i, j: (j, 0)),   # W_sigma
                    pl.BlockSpec((1, in_f), lambda i, j: (0, 0)),    # eps_in (fetched once)
                    pl.BlockSpec((2, tn), lambda i, j: (0, j)),      # [eps_out; bias]
                ],
                out_specs=pl.BlockSpec((tm, tn), lambda i, j: (i, j)),
            ),
            compiler_params=pltpu.CompilerParams(
                dimension_semantics=("parallel", "parallel"),
                vmem_limit_bytes=_vmem_limit(footprint),
            ),
        )(x_p, wmu, wsig, eps_in2, eo_b)
    else:
        grid = (Mp // tm, out_f // tn, Kp // tk)
        footprint = _vmem_footprint(tm, tn, tk, wsz, n_scratch=2)
        out = pl.pallas_call(
            _noisy_linear_kgrid_kernel,
            out_shape=jax.ShapeDtypeStruct((Mp, out_f), x.dtype),
            grid_spec=pltpu.PrefetchScalarGridSpec(
                num_scalar_prefetch=0,
                grid=grid,
                in_specs=[
                    pl.BlockSpec((tm, tk), lambda i, j, k: (i, k)),  # x
                    pl.BlockSpec((tn, tk), lambda i, j, k: (j, k)),  # W_mu
                    pl.BlockSpec((tn, tk), lambda i, j, k: (j, k)),  # W_sigma
                    pl.BlockSpec((1, tk), lambda i, j, k: (0, k)),   # eps_in
                    pl.BlockSpec((2, tn), lambda i, j, k: (0, j)),   # [eps_out; bias]
                ],
                out_specs=pl.BlockSpec((tm, tn), lambda i, j, k: (i, j)),
                scratch_shapes=[pltpu.VMEM((tm, tn), jnp.float32),
                                pltpu.VMEM((tm, tn), jnp.float32)],
            ),
            compiler_params=pltpu.CompilerParams(
                dimension_semantics=("parallel", "parallel", "arbitrary"),
                vmem_limit_bytes=_vmem_limit(footprint),
            ),
        )(x_p, wmu, wsig, eps_in2, eo_b)

    return out[:B, :]


# ----------------------------------------------------------------------------
# parameter construction (mirrors reset_parameters() + reset_noise())
# ----------------------------------------------------------------------------
def scale_noise(key, size):
    """PyTorch _scale_noise: sign(x) * sqrt(|x|) with x ~ N(0, 1)."""
    x = jax.random.normal(key, (size,), dtype=jnp.float32)
    return jnp.sign(x) * jnp.sqrt(jnp.abs(x))


def _make_layer(key, in_features, out_features, std_init=0.5,
                weight_dtype=jnp.float32):
    """Factorized NoisyLinear params/noise.  `weight_dtype=jnp.bfloat16`
    enables the recommended bf16 weight streaming (cast once here, not per
    call); MXU accumulation stays f32 in the kernel."""
    k_wmu, k_bmu, k_ei, k_eo, k_be = jax.random.split(key, 5)
    std = math.sqrt(3.0 / in_features)
    weight_mu = jax.random.uniform(k_wmu, (out_features, in_features),
                                   minval=-std, maxval=std, dtype=jnp.float32)
    bias_mu = jax.random.uniform(k_bmu, (out_features,),
                                 minval=-std, maxval=std, dtype=jnp.float32)
    weight_sigma = jnp.full((out_features, in_features),
                            std_init / math.sqrt(in_features), dtype=jnp.float32)
    bias_sigma = jnp.full((out_features,),
                          std_init / math.sqrt(out_features), dtype=jnp.float32)
    eps_in = scale_noise(k_ei, in_features)
    eps_out = scale_noise(k_eo, out_features)
    bias_eps = scale_noise(k_be, out_features)
    return (weight_mu.astype(weight_dtype), weight_sigma.astype(weight_dtype),
            eps_in, eps_out, bias_mu, bias_sigma, bias_eps)


def _reference(x, weight_mu, weight_sigma, eps_in, eps_out,
               bias_mu, bias_sigma, bias_eps):
    w = (weight_mu.astype(jnp.float32)
         + weight_sigma.astype(jnp.float32) * jnp.outer(eps_out, eps_in))
    b = bias_mu + bias_sigma * bias_eps
    return jnp.dot(x, w.T, preferred_element_type=jnp.float32) + b


if __name__ == "__main__":
    key = jax.random.PRNGKey(0)
    k1, k2, k3 = jax.random.split(key, 3)

    # --- Case 1: the module's toy shape (B=8, in=32, out=64). Full-K path,
    #             single (1,1) grid step, no padding anywhere. ---------------
    B, in_f, out_f = 8, 32, 64
    kx, kl = jax.random.split(k1)
    params = _make_layer(kl, in_f, out_f)
    x = jax.random.normal(kx, (B, in_f), dtype=jnp.float32)
    y = jax.block_until_ready(noisy_linear_forward(x, *params))
    y_ref = _reference(x, *params)
    assert y.shape == (B, out_f)
    assert jnp.allclose(y, y_ref, atol=1e-4, rtol=1e-4), "case 1 mismatch"

    # --- Case 2: ragged shape (B=12, in=384, out=200), full-K path with a
    #             forced small tm to exercise a multi-block M grid and the
    #             "full-dim N block, no weight padding" route. ---------------
    B2, in_f2, out_f2 = 12, 384, 200
    kx2, kl2 = jax.random.split(k2)
    params2 = _make_layer(kl2, in_f2, out_f2)
    x2 = jax.random.normal(kx2, (B2, in_f2), dtype=jnp.float32)
    y2 = jax.block_until_ready(noisy_linear_forward(x2, *params2, tm=8))
    y2_ref = _reference(x2, *params2)
    assert y2.shape == (B2, out_f2)
    assert jnp.allclose(y2, y2_ref, atol=1e-4, rtol=1e-4), "case 2 mismatch"

    # --- Case 3: force the K-grid fallback (tk=128 -> grid (2,1,3)) to cover
    #             the accumulator / pl.when path. ----------------------------
    y3 = jax.block_until_ready(noisy_linear_forward(x2, *params2, tm=8, tk=128))
    assert jnp.allclose(y3, y2_ref, atol=1e-4, rtol=1e-4), "case 3 mismatch"

    # --- Case 4: optional bf16 weight streaming (perf-review item), f32
    #             accumulation; looser tolerance vs. the f32 reference. ------
    B4, in_f4, out_f4 = 16, 256, 128
    kx4, kl4 = jax.random.split(k3)
    params4 = _make_layer(kl4, in_f4, out_f4, weight_dtype=jnp.bfloat16)
    x4 = jax.random.normal(kx4, (B4, in_f4), dtype=jnp.float32)
    y4 = jax.block_until_ready(noisy_linear_forward(x4, *params4))
    y4_ref = _reference(x4, *params4)
    assert y4.shape == (B4, out_f4)
    assert jnp.allclose(y4, y4_ref, atol=5e-2, rtol=5e-2), "case 4 mismatch"

    print("KERNEL_OK")
</pallas_src>

<mosaic_0001>
module attributes {stable_mosaic.version = 11 : i64} {
  func.func @_noisy_linear_fullk_kernel(%arg0: i32, %arg1: i32, %arg2: memref<8x32xf32, #tpu.memory_space<vmem>>, %arg3: memref<64x32xf32, #tpu.memory_space<vmem>>, %arg4: memref<64x32xf32, #tpu.memory_space<vmem>>, %arg5: memref<1x32xf32, #tpu.memory_space<vmem>>, %arg6: memref<2x64xf32, #tpu.memory_space<vmem>>, %arg7: memref<8x64xf32, #tpu.memory_space<vmem>>) attributes {dimension_semantics = [#tpu.dimension_semantics<parallel>, #tpu.dimension_semantics<parallel>], iteration_bounds = array<i64: 1, 1>, scalar_prefetch = 0 : i64, scratch_operands = 0 : i64, tpu.core_type = #tpu.core_type<tc>, window_params = [{transform_indices = @transform_0, window_bounds = array<i64: 8, 32>}, {transform_indices = @transform_1, window_bounds = array<i64: 64, 32>}, {transform_indices = @transform_2, window_bounds = array<i64: 64, 32>}, {pipeline_mode = #tpu.pipeline_mode<synchronous>, transform_indices = @transform_3, window_bounds = array<i64: 1, 32>}, {transform_indices = @transform_4, window_bounds = array<i64: 2, 64>}, {transform_indices = @transform_5, window_bounds = array<i64: 8, 64>}]} {
    %c0 = arith.constant 0 : index
    %c0_0 = arith.constant 0 : index
    %0 = vector.load %arg2[%c0, %c0_0] : memref<8x32xf32, #tpu.memory_space<vmem>>, vector<8x32xf32>
    %c0_1 = arith.constant 0 : index
    %c0_2 = arith.constant 0 : index
    %1 = vector.load %arg3[%c0_1, %c0_2] : memref<64x32xf32, #tpu.memory_space<vmem>>, vector<64x32xf32>
    %cst = arith.constant dense<0.000000e+00> : vector<8x64xf32>
    %2 = tpu.matmul %0, %1, %cst {dimension_numbers = #tpu.dot_dimension_numbers<[1], [1], [0], [0], [0, 0, 1, 0], [], []>} : vector<8x32xf32>, vector<64x32xf32>, vector<8x64xf32> -> vector<8x64xf32>
    %c0_3 = arith.constant 0 : index
    %c0_4 = arith.constant 0 : index
    %3 = vector.load %arg5[%c0_3, %c0_4] : memref<1x32xf32, #tpu.memory_space<vmem>>, vector<1x32xf32>
    %4 = vector.broadcast %3 : vector<1x32xf32> to vector<8x32xf32>
    %5 = arith.mulf %0, %4 : vector<8x32xf32>
    %c0_5 = arith.constant 0 : index
    %c0_6 = arith.constant 0 : index
    %6 = vector.load %arg4[%c0_5, %c0_6] : memref<64x32xf32, #tpu.memory_space<vmem>>, vector<64x32xf32>
    %cst_7 = arith.constant dense<0.000000e+00> : vector<8x64xf32>
    %7 = tpu.matmul %5, %6, %cst_7 {dimension_numbers = #tpu.dot_dimension_numbers<[1], [1], [0], [0], [0, 0, 1, 0], [], []>} : vector<8x32xf32>, vector<64x32xf32>, vector<8x64xf32> -> vector<8x64xf32>
    %c0_8 = arith.constant 0 : index
    %c0_9 = arith.constant 0 : index
    %8 = vector.load %arg6[%c0_8, %c0_9] : memref<2x64xf32, #tpu.memory_space<vmem>>, vector<1x64xf32>
    %c1 = arith.constant 1 : index
    %c0_10 = arith.constant 0 : index
    %9 = vector.load %arg6[%c1, %c0_10] : memref<2x64xf32, #tpu.memory_space<vmem>>, vector<1x64xf32>
    %10 = vector.broadcast %8 : vector<1x64xf32> to vector<8x64xf32>
    %11 = arith.mulf %10, %7 : vector<8x64xf32>
    %12 = arith.addf %2, %11 : vector<8x64xf32>
    %13 = vector.broadcast %9 : vector<1x64xf32> to vector<8x64xf32>
    %14 = arith.addf %12, %13 : vector<8x64xf32>
    %c0_11 = arith.constant 0 : index
    %c0_12 = arith.constant 0 : index
    %15 = vector.load %arg7[%c0_11, %c0_12] : memref<8x64xf32, #tpu.memory_space<vmem>>, vector<8x64xf32>
    tpu.vector_store %arg7[%c0_11, %c0_12], %14 {strides = array<i32>} : memref<8x64xf32, #tpu.memory_space<vmem>>, vector<8x64xf32>,
    return
  }
  func.func @transform_0(%arg0: i32, %arg1: i32) -> (i32, i32) {
    %c0_i32 = arith.constant 0 : i32
    %c0_i32_0 = arith.constant 0 : i32
    return %arg0, %c0_i32 : i32, i32
  }
  func.func @transform_1(%arg0: i32, %arg1: i32) -> (i32, i32) {
    %c0_i32 = arith.constant 0 : i32
    %c0_i32_0 = arith.constant 0 : i32
    return %arg1, %c0_i32 : i32, i32
  }
  func.func @transform_2(%arg0: i32, %arg1: i32) -> (i32, i32) {
    %c0_i32 = arith.constant 0 : i32
    %c0_i32_0 = arith.constant 0 : i32
    return %arg1, %c0_i32 : i32, i32
  }
  func.func @transform_3(%arg0: i32, %arg1: i32) -> (i32, i32) {
    %c0_i32 = arith.constant 0 : i32
    %c0_i32_0 = arith.constant 0 : i32
    %c0_i32_1 = arith.constant 0 : i32
    return %c0_i32, %c0_i32_0 : i32, i32
  }
  func.func @transform_4(%arg0: i32, %arg1: i32) -> (i32, i32) {
    %c0_i32 = arith.constant 0 : i32
    %c0_i32_0 = arith.constant 0 : i32
    return %c0_i32, %arg1 : i32, i32
  }
  func.func @transform_5(%arg0: i32, %arg1: i32) -> (i32, i32) {
    %c0_i32 = arith.constant 0 : i32
    return %arg0, %arg1 : i32, i32
  }
}

</mosaic_0001>

<bundles_post_ra>
// kernel: tpu_custom_call.1
= control target key start
LH: loop header
LB: loop body
LE: loop exit
PB: predicated region body
PF: predicated region fallthrough
CT: control target
= control target key end

     0   :  { %vm43_vm0 = vcmask 261120   ;;  %s322_s0 = inlined_call_operand.vmem [shape: f32[8,32], index: 0, kind: input, shape index: {}]   ;;  %s323_s1 = inlined_call_operand.vmem [shape: f32[64,32], index: 1, kind: input, shape index: {}]   ;;  %s324_s2 = inlined_call_operand.vmem [shape: f32[64,32], index: 2, kind: input, shape index: {}]   ;;  %s325_s3 = inlined_call_operand.vmem [shape: f32[1,32], index: 3, kind: input, shape index: {}]   ;;  %s326_s4 = inlined_call_operand.vmem [shape: f32[2,64], index: 4, kind: input, shape index: {}]   ;;  %s327_s5 = inlined_call_operand.hbm [shape: f32[8,64], index: 5, kind: output, shape index: {}]  }
   0x1   :  { %v42_v0 = vld [vmem:[%s324_s2 + $0x38] sm:$0xff]  ;;  %v41_v2 = vld [vmem:[%s324_s2 + $0x30] sm:$0xff]  ;;  %v40_v4 = vld [vmem:[%s324_s2 + $0x28] sm:$0xff] }
   0x2   :  { %v29_v1 = vld [vmem:[%s323_s1 + $0x38] sm:$0xff]  ;;  %162 = vmatpush.xpose.msk.msra.mxu0 %vm43_vm0, %v42_v0  ;;  %v28_v3 = vld [vmem:[%s323_s1 + $0x30] sm:$0xff]  ;;  %v27_v5 = vld [vmem:[%s323_s1 + $0x28] sm:$0xff] }
   0x3   :  { %171 = vmatpush.xpose.msk.msra.mxu1 %vm43_vm0, %v29_v1 }
   0x6   :  { %163 = vmatpush.xpose.msk.msra.mxu0 %vm43_vm0, %v41_v2 }
   0x7   :  { %172 = vmatpush.xpose.msk.msra.mxu1 %vm43_vm0, %v28_v3 }
   0x8   :  { %10 = vsyncpa [#allocation3], 0  ;;  %v39_v6 = vld [vmem:[%s324_s2 + $0x20] sm:$0xff]  ;;  %v38_v8 = vld [vmem:[%s324_s2 + $0x18] sm:$0xff]  ;;  %s153_s8 = sshll.u32 %s327_s5, 4  ;;  %vm144_vm1 = vcmask 523264   ;;  %s154_s8 = int_to_ptr.hbm [resolvable:$true] %s153_s8 }
   0x9   :  { %v26_v7 = vld [vmem:[%s323_s1 + $0x20] sm:$0xff]  ;;  %v25_v9 = vld [vmem:[%s323_s1 + $0x18] sm:$0xff]  ;;  %v37_v10 = vld [vmem:[%s324_s2 + $0x10] sm:$0xff] }
   0xa   :  { %164 = vmatpush.xpose.msk.msra.mxu0 %vm43_vm0, %v40_v4  ;;  %v24_v11 = vld [vmem:[%s323_s1 + $0x10] sm:$0xff]  ;;  %v36_v12 = vld [vmem:[%s324_s2 + $0x8] sm:$0xff]  ;;  %v181_v14 = vld [vmem:[%s325_s3] ss:$0 sm:$0xff] }
   0xb   :  { %173 = vmatpush.xpose.msk.msra.mxu1 %vm43_vm0, %v27_v5  ;;  %v23_v13 = vld [vmem:[%s323_s1 + $0x8] sm:$0xff]  ;;  %v21_v15 = vld [vmem:[%s322_s0] sm:$0xff] }
   0xc   :  { %v35_v16 = vld [vmem:[%s324_s2] sm:$0xff]  ;;  %v34_v18 = vmul.f32 %v181_v14, %v21_v15 }
   0xd   :  { %v22_v17 = vld [vmem:[%s323_s1] sm:$0xff]  ;;  %s210_s1 = smov [#allocation2]  }
   0xe   :  { %165 = vmatpush.xpose.msk.msra.mxu0 %vm43_vm0, %v39_v6  ;;  %v182_v19 = vld [vmem:[%s326_s4] ss:$0 sm:$0xff]  ;;  %v183_v23 = vld [vmem:[%s326_s4 + $0x1] ss:$0 sm:$0xff]  ;;  %s151_s30 = sshll.u32 %s210_s1, 4  ;;  %s152_s30 = int_to_ptr.vmem [resolvable:$true] %s151_s30 }
   0xf   :  { %174 = vmatpush.xpose.msk.msra.mxu1 %vm43_vm0, %v26_v7 }
  0x12   :  { %166 = vmatpush.xpose.msk.msra.mxu0 %vm43_vm0, %v38_v8 }
  0x13   :  { %175 = vmatpush.xpose.msk.msra.mxu1 %vm43_vm0, %v25_v9 }
  0x16   :  { %167 = vmatpush.xpose.msk.msra.mxu0 %vm43_vm0, %v37_v10 }
  0x17   :  { %176 = vmatpush.xpose.msk.msra.mxu1 %vm43_vm0, %v24_v11 }
  0x1a   :  { %168 = vmatpush.xpose.msk.msra.mxu0 %vm43_vm0, %v36_v12 }
  0x1b   :  { %177 = vmatpush.xpose.msk.msra.mxu1 %vm43_vm0, %v23_v13 }
  0x1e   :  { %169 = vmatpush.xpose.msk.msra.mxu0 %vm43_vm0, %v35_v16 }
  0x1f   :  { %178 = vmatpush.xpose.msk.msra.mxu1 %vm43_vm0, %v22_v17 }
  0x21   :  { %170 = vmatmul.msk.f32.vlgmr.msra.gmra.mxu0 %vm43_vm0, %v34_v18 }
  0x22   :  { %179 = vmatmul.msk.f32.vlgmr.msra.gmra.mxu1 %vm43_vm0, %v21_v15 }
  0x9e   :  { %v88_v20 = vpop.f32.mrf.mxu0 }
  0x9f   :  { %v139_v21 = vpop.f32.mrf.mxu1  ;;  %v94_v22 = vmul.f32 %v182_v19, %v88_v20 }
  0xa1   :  { %v140_v24 = vadd.f32 %v139_v21, %v94_v22 }
  0xa3   :  { %v143_v25 = vadd.f32 %v183_v23, %v140_v24 }
  0xa5   :  { %145 = vst.msk [vmem:[#allocation2] sm:$0xff] %vm144_vm1, %v143_v25 }
  0xa6   :  { %156 = dma.vmem_to_hbm [thread:$0]  %s152_s30, 128, %s154_s8, [#allocation3]  }
  0xa7   :  { %208 = dma.done.wait [#allocation3], 128  }
  0xa8   :  { %209 = vsyncadd [#allocation3], 4294967168 }
  0xa9   :  { %161 = vsyncpa [#allocation3], 1 }

</bundles_post_ra>
